<compile_context>
chip_gen: v6e
topology: v6e:2x2x1
jax: 0.10.0
libtpu: 0.0.40
codegen_flags: <defaults>
</compile_context>

<pallas_src>
import functools

import jax
import jax.numpy as jnp
from jax import lax
from jax.experimental import pallas as pl
from jax.experimental.pallas import tpu as pltpu

_MIB = 1024 * 1024
_BLOCK_BUDGET = 24 * _MIB   # target VMEM footprint of one grid step (all buffers)
_NEG = -1.0e30              # big finite negative: exp() underflows to exactly 0.0


# ---------------------------------------------------------------------------
# Tiling heuristics
# ---------------------------------------------------------------------------

def _sublane_align(dtype):
    """Sublane multiple for a fully packed vreg tile of this dtype."""
    return max(8, 32 // jnp.dtype(dtype).itemsize)


def _largest_aligned_divisor(n, limit, align):
    best = 0
    t = align
    hi = min(limit, n)
    while t <= hi:
        if n % t == 0:
            best = t
        t += align
    return best


def _choose_row_tile(sq, target_rows, align_pref, align_min):
    """Largest row tile dividing sq that fits the row budget, preferring the
    better-packed alignment unless it costs more than 2x in tile size."""
    if sq <= target_rows:
        return sq
    best_pref = _largest_aligned_divisor(sq, target_rows, align_pref)
    best_min = _largest_aligned_divisor(sq, target_rows, align_min)
    if best_pref > 0 and best_pref * 2 >= best_min:
        return best_pref
    if best_min > 0:
        return best_min
    for t in range(8, sq, 8):             # rare fallback: smallest 8-aligned divisor
        if sq % t == 0:
            return t
    return sq                             # full extent always satisfies the block rule


def _choose_head_tile(n, tq, target_rows):
    """Pack several heads per grid step when each head contributes few rows."""
    best = 1
    for t in range(1, n + 1):
        if n % t == 0 and t * tq <= target_rows:
            best = t
    return best


def _ensure_megacore(b, n, tn, sq, tq):
    """v7x has 2 TensorCores: make sure the parallel grid has >= 2 steps."""
    if b * (n // tn) * (sq // tq) >= 2:
        return tn, tq
    if n > 1:
        tn = max(d for d in range(1, n) if n % d == 0 and n // d >= 2)
        return tn, tq
    half = _largest_aligned_divisor(sq, sq // 2, 8)
    if half:
        return tn, half
    return tn, tq


def _choose_key_tile(sk):
    """Key-tile width for the causal online path: a multiple of 128 that divides
    sk, >= 512 (keeps per-step DMAs large enough to hide step overhead) and
    giving at most 8 key tiles."""
    if sk <= 1024:
        return sk
    lo = max(512, (sk + 7) // 8)
    t = ((lo + 127) // 128) * 128
    while t < sk:
        if sk % t == 0:
            return t
        t += 128
    return sk


def _vmem_limit(footprint_bytes):
    """Footprint-based scoped-VMEM request (headroom for compiler temporaries),
    far below physical capacity on every TPU generation."""
    return int(min(96 * _MIB, max(32 * _MIB, footprint_bytes * 3 // 2 + 8 * _MIB)))


# ---------------------------------------------------------------------------
# Kernels
# ---------------------------------------------------------------------------

def _softmax_body(x, out_dtype, approx_recip):
    m = jnp.max(x, axis=-1, keepdims=True)
    e = jnp.exp(x - m)
    s = jnp.sum(e, axis=-1, keepdims=True)
    if approx_recip:
        # EUP-slot approximate reciprocal: error far below bf16/fp16 precision.
        p = e * pl.reciprocal(s, approx=True)
    else:
        p = e / s                         # exact path for fp32 outputs
    return p.astype(out_dtype)


def _scaled_masked_softmax_kernel(x_ref, mask_ref, o_ref, *, scale, approx_recip):
    # x_ref   : (TN, TQ, sk) scores
    # mask_ref: (1,  TQ, sk) bool/int, nonzero == masked (broadcast over heads)
    x = x_ref[...].astype(jnp.float32) * scale
    m = mask_ref[...]
    masked = m if m.dtype == jnp.bool_ else (m != 0)      # stay in int/bool domain
    # NOTE: fully-masked rows produce a uniform 1/sk row (the -10000.0 fill),
    # matching the Apex fused kernel.
    x = jnp.where(masked, jnp.float32(-10000.0), x)
    o_ref[...] = _softmax_body(x, o_ref.dtype, approx_recip)


def _scaled_softmax_kernel(x_ref, o_ref, *, scale, approx_recip):
    x = x_ref[...].astype(jnp.float32) * scale
    o_ref[...] = _softmax_body(x, o_ref.dtype, approx_recip)


def _scaled_causal_softmax_kernel(x_ref, o_ref, *, scale, approx_recip):
    # Single key-tile causal path (sk small): x_ref (TN, TQ, sk); q-tile axis = 2.
    tn, tq, sk = x_ref.shape
    q0 = pl.program_id(2) * tq
    x = x_ref[...].astype(jnp.float32) * scale
    row = lax.broadcasted_iota(jnp.int32, (tq, sk), 0) + q0
    col = lax.broadcasted_iota(jnp.int32, (tq, sk), 1)
    x = jnp.where((col > row)[None], jnp.float32(_NEG), x)   # exp -> exactly 0.0
    o_ref[...] = _softmax_body(x, o_ref.dtype, approx_recip)


def _causal_online_kernel(x_ref, o_ref, acc_ref, m_ref, l_ref, *,
                          scale, tq, tk, approx_recip):
    # x_ref : (TN, TQ, TK)  -- the ki-th key tile; the index_map clamps ki so
    #         tiles entirely above the diagonal are never fetched from HBM.
    # o_ref : (TN, TQ, sk)  -- resident across the ki axis, written at finalize.
    # acc_ref: (nk, TN, TQ, TK) fp32  -- per-key-tile unnormalized exp values.
    # m_ref / l_ref: (TN, TQ, nk) fp32 -- per-key-tile row max / row sum.
    qi = pl.program_id(2)
    ki = pl.program_id(3)
    nk = pl.num_programs(3)
    last_needed = ((qi + 1) * tq - 1) // tk    # last key tile touching the diagonal

    @pl.when(ki == 0)
    def _init():
        m_ref[...] = jnp.full(m_ref.shape, _NEG, dtype=m_ref.dtype)
        l_ref[...] = jnp.zeros(l_ref.shape, dtype=l_ref.dtype)

    @pl.when(ki <= last_needed)
    def _accumulate():
        x = x_ref[...].astype(jnp.float32) * scale
        row = lax.broadcasted_iota(jnp.int32, (tq, tk), 0) + qi * tq
        col = lax.broadcasted_iota(jnp.int32, (tq, tk), 1) + ki * tk
        x = jnp.where((col > row)[None], jnp.float32(_NEG), x)
        m_j = jnp.max(x, axis=-1, keepdims=True)              # (TN, TQ, 1)
        e = jnp.exp(x - m_j)                                   # masked -> exactly 0
        l_j = jnp.sum(e, axis=-1, keepdims=True)
        acc_ref[ki] = e
        hot = lax.broadcasted_iota(jnp.int32, (1, 1, nk), 2) == ki
        m_ref[...] = jnp.where(hot, m_j, m_ref[...])
        l_ref[...] = jnp.where(hot, l_j, l_ref[...])

    @pl.when(ki == nk - 1)
    def _finalize():
        m_all = m_ref[...]                                     # (TN, TQ, nk)
        m_row = jnp.max(m_all, axis=-1, keepdims=True)
        corr = jnp.exp(m_all - m_row)                          # unused tiles -> 0.0
        l_row = jnp.sum(l_ref[...] * corr, axis=-1, keepdims=True)
        if approx_recip:
            inv_l = pl.reciprocal(l_row, approx=True)
        else:
            inv_l = 1.0 / l_row
        nk_static = acc_ref.shape[0]
        tn = o_ref.shape[0]
        for j in range(nk_static):
            lo = j * tk

            @pl.when(j <= last_needed)
            def _store(j=j, lo=lo):
                o_ref[:, :, lo:lo + tk] = (
                    acc_ref[j] * (corr[:, :, j:j + 1] * inv_l)
                ).astype(o_ref.dtype)

            @pl.when(j > last_needed)
            def _zero(lo=lo):
                o_ref[:, :, lo:lo + tk] = jnp.zeros((tn, tq, tk), dtype=o_ref.dtype)


# ---------------------------------------------------------------------------
# Wrappers
# ---------------------------------------------------------------------------

def scaled_masked_softmax(x, mask, scale):
    """x: (b, np, sq, sk); mask: (b, 1, sq, sk) bool/int, nonzero == masked."""
    b, n, sq, sk = x.shape
    assert mask.shape == (b, 1, sq, sk)
    xb = jnp.dtype(x.dtype).itemsize
    approx = x.dtype != jnp.float32

    per_row = sk * (4 * xb + 10)                       # in/out double-buffered + temps
    target = max(_sublane_align(x.dtype), min(1024, _BLOCK_BUDGET // per_row))
    align_min = _sublane_align(x.dtype)
    align_pref = max(align_min, _sublane_align(mask.dtype))
    tq = _choose_row_tile(sq, target, align_pref, align_min)
    tn = _choose_head_tile(n, tq, target)
    tn, tq = _ensure_megacore(b, n, tn, sq, tq)

    # heads innermost -> the mask block index is constant across consecutive
    # steps, so its DMA is issued once per (batch, q-tile) and reused.
    grid = (b, sq // tq, n // tn)
    footprint = tn * tq * sk * (4 * xb + 8) + tq * sk * 2

    # TODO(synk): optional input_output_aliases={0: 0} (in-place) when the
    # caller does not reuse the raw scores; sweep pipeline_mode=pl.Buffered(3)
    # on the x spec if a profile shows exposed DMA.
    return pl.pallas_call(
        functools.partial(_scaled_masked_softmax_kernel,
                          scale=float(scale), approx_recip=approx),
        out_shape=jax.ShapeDtypeStruct((b, n, sq, sk), x.dtype),
        grid_spec=pltpu.PrefetchScalarGridSpec(
            num_scalar_prefetch=0,
            grid=grid,
            in_specs=[
                pl.BlockSpec((None, tn, tq, sk), lambda bi, qi, ni: (bi, ni, qi, 0)),
                pl.BlockSpec((None, 1, tq, sk), lambda bi, qi, ni: (bi, 0, qi, 0)),
            ],
            out_specs=pl.BlockSpec((None, tn, tq, sk),
                                   lambda bi, qi, ni: (bi, ni, qi, 0)),
        ),
        compiler_params=pltpu.CompilerParams(
            dimension_semantics=("parallel", "parallel", "parallel"),
            vmem_limit_bytes=_vmem_limit(footprint)),
    )(x, mask)


def scaled_softmax(x, scale):
    """x: (b, np, sq, sk); no mask."""
    b, n, sq, sk = x.shape
    xb = jnp.dtype(x.dtype).itemsize
    approx = x.dtype != jnp.float32

    per_row = sk * (4 * xb + 8)
    align = _sublane_align(x.dtype)
    target = max(align, min(1024, _BLOCK_BUDGET // per_row))
    tq = _choose_row_tile(sq, target, align, align)
    tn = _choose_head_tile(n, tq, target)
    tn, tq = _ensure_megacore(b, n, tn, sq, tq)

    grid = (b, n // tn, sq // tq)
    footprint = tn * tq * sk * (4 * xb + 8)

    return pl.pallas_call(
        functools.partial(_scaled_softmax_kernel,
                          scale=float(scale), approx_recip=approx),
        out_shape=jax.ShapeDtypeStruct((b, n, sq, sk), x.dtype),
        grid_spec=pltpu.PrefetchScalarGridSpec(
            num_scalar_prefetch=0,
            grid=grid,
            in_specs=[pl.BlockSpec((None, tn, tq, sk),
                                   lambda bi, ni, qi: (bi, ni, qi, 0))],
            out_specs=pl.BlockSpec((None, tn, tq, sk),
                                   lambda bi, ni, qi: (bi, ni, qi, 0)),
        ),
        compiler_params=pltpu.CompilerParams(
            dimension_semantics=("parallel", "parallel", "parallel"),
            vmem_limit_bytes=_vmem_limit(footprint)),
    )(x)


def scaled_upper_triang_masked_softmax(x, scale, block_q=None, block_k=None):
    """x: (b, np, sq, sk) with sq == sk (causal self-attention)."""
    b, n, sq, sk = x.shape
    assert sq == sk, "causal mask is only for self attention"
    xb = jnp.dtype(x.dtype).itemsize
    approx = x.dtype != jnp.float32
    align = _sublane_align(x.dtype)

    tk = block_k if block_k is not None else _choose_key_tile(sk)
    assert sk % tk == 0 and (tk % 128 == 0 or tk == sk)
    nk = sk // tk

    if nk == 1:
        # Small sk: single-pass kernel (no per-tile stats machinery needed).
        per_row = sk * (4 * xb + 8)
        target = max(align, min(1024, _BLOCK_BUDGET // per_row))
        tq = block_q if block_q is not None else _choose_row_tile(sq, target, align, align)
        tn = _choose_head_tile(n, tq, target)
        tn, tq = _ensure_megacore(b, n, tn, sq, tq)
        grid = (b, n // tn, sq // tq)
        footprint = tn * tq * sk * (4 * xb + 8)
        return pl.pallas_call(
            functools.partial(_scaled_causal_softmax_kernel,
                              scale=float(scale), approx_recip=approx),
            out_shape=jax.ShapeDtypeStruct((b, n, sq, sk), x.dtype),
            grid_spec=pltpu.PrefetchScalarGridSpec(
                num_scalar_prefetch=0,
                grid=grid,
                in_specs=[pl.BlockSpec((None, tn, tq, sk),
                                       lambda bi, ni, qi: (bi, ni, qi, 0))],
                out_specs=pl.BlockSpec((None, tn, tq, sk),
                                       lambda bi, ni, qi: (bi, ni, qi, 0)),
            ),
            compiler_params=pltpu.CompilerParams(
                dimension_semantics=("parallel", "parallel", "parallel"),
                vmem_limit_bytes=_vmem_limit(footprint)),
        )(x)

    # Online (key-tiled) path: the strict upper triangle is neither read from
    # HBM nor exponentiated.
    per_row = sk * (4 + 2 * xb) + tk * (2 * xb + 12) + 1024
    target = max(align, min(1024, _BLOCK_BUDGET // per_row))
    tq = block_q if block_q is not None else _choose_row_tile(sq, target, align, align)
    tn = _choose_head_tile(n, tq, target)
    tn, tq = _ensure_megacore(b, n, tn, sq, tq)
    grid = (b, n // tn, sq // tq, nk)

    def x_map(bi, ni, qi, ki):
        # Clamp to the last key tile touching the diagonal for this q-tile:
        # consecutive identical block indices make Pallas skip the DMA.
        return (bi, ni, qi, jnp.minimum(ki, ((qi + 1) * tq - 1) // tk))

    footprint = (tn * tq * sk * 4                 # fp32 acc scratch
                 + tn * tq * sk * xb * 2          # resident output block (2 buffers)
                 + tn * tq * tk * (2 * xb + 12)   # x tile (2 buffers) + fp32 temps
                 + tn * tq * 128 * 4 * 2)         # per-tile stats (padded lanes)

    return pl.pallas_call(
        functools.partial(_causal_online_kernel, scale=float(scale),
                          tq=tq, tk=tk, approx_recip=approx),
        out_shape=jax.ShapeDtypeStruct((b, n, sq, sk), x.dtype),
        grid_spec=pltpu.PrefetchScalarGridSpec(
            num_scalar_prefetch=0,
            grid=grid,
            in_specs=[pl.BlockSpec((None, tn, tq, tk), x_map)],
            out_specs=pl.BlockSpec((None, tn, tq, sk),
                                   lambda bi, ni, qi, ki: (bi, ni, qi, 0)),
            scratch_shapes=[
                pltpu.VMEM((nk, tn, tq, tk), jnp.float32),
                pltpu.VMEM((tn, tq, nk), jnp.float32),
                pltpu.VMEM((tn, tq, nk), jnp.float32),
            ],
        ),
        compiler_params=pltpu.CompilerParams(
            dimension_semantics=("parallel", "parallel", "parallel", "arbitrary"),
            vmem_limit_bytes=_vmem_limit(footprint)),
    )(x)


class FusedScaleMaskSoftmax:
    """JAX/Pallas port of Apex FusedScaleMaskSoftmax (fused forward path).

    Softmax is always computed in fp32 and cast back to the input dtype,
    matching input_in_{fp16,bf16} + softmax_in_fp32 in Apex.
    """

    def __init__(self, attn_mask_type="padding", scale=None):
        assert attn_mask_type in ("padding", "causal")
        self.attn_mask_type = attn_mask_type
        self.scale = 1.0 if scale is None else scale

    def __call__(self, x, mask):
        assert x.ndim == 4
        if self.attn_mask_type == "causal":
            # mask argument is ignored in the causal fused path (as in Apex)
            return scaled_upper_triang_masked_softmax(x, self.scale)
        if mask is not None:
            return scaled_masked_softmax(x, mask, self.scale)
        return scaled_softmax(x, self.scale)


# ---------------------------------------------------------------------------
# Plain-JAX references (mirror forward_torch_softmax semantics)
# ---------------------------------------------------------------------------

def _ref_padding(x, mask, scale):
    xf = x.astype(jnp.float32) * scale
    xf = jnp.where(mask != 0, -10000.0, xf)
    return jax.nn.softmax(xf, axis=-1).astype(x.dtype)


def _ref_causal(x, scale):
    _, _, sq, sk = x.shape
    xf = x.astype(jnp.float32) * scale
    tri = jnp.triu(jnp.ones((sq, sk), dtype=bool), k=1)
    xf = jnp.where(tri[None, None], -jnp.inf, xf)
    return jax.nn.softmax(xf, axis=-1).astype(x.dtype)


# ---------------------------------------------------------------------------
# Main
# ---------------------------------------------------------------------------

if __name__ == "__main__":
    key = jax.random.PRNGKey(0)
    k1, k2, k3, k4 = jax.random.split(key, 4)
    scale = 0.125  # e.g. 1/sqrt(head_dim)

    def check(out, ref, tol=2e-2):
        assert out.shape == ref.shape and out.dtype == ref.dtype
        assert jnp.allclose(out.astype(jnp.float32), ref.astype(jnp.float32),
                            atol=tol, rtol=tol)

    # 1) padding-mask path: bf16 scores, bool mask fed directly ---------------
    b, n, sq, sk = 2, 4, 16, 256
    x = jax.random.normal(k1, (b, n, sq, sk), dtype=jnp.float32).astype(jnp.bfloat16)
    key_pos = jnp.arange(sk)[None, None, None, :]
    mask = jnp.broadcast_to(key_pos >= (sk - 64), (b, 1, sq, sk))        # bool
    pad = FusedScaleMaskSoftmax(attn_mask_type="padding", scale=scale)
    out = jax.block_until_ready(pad(x, mask))
    check(out, _ref_padding(x, mask, scale))

    # 2) no-mask scaled softmax ------------------------------------------------
    out = jax.block_until_ready(pad(x, None))
    ref = jax.nn.softmax(x.astype(jnp.float32) * scale, axis=-1).astype(x.dtype)
    check(out, ref)

    # 3) fp32 scores + integer mask (exact-reciprocal path) --------------------
    xf = jax.random.normal(k2, (1, 2, 8, 128), dtype=jnp.float32)
    maski = (jax.random.uniform(k3, (1, 1, 8, 128)) < 0.25).astype(jnp.int8)
    out = jax.block_until_ready(scaled_masked_softmax(xf, maski, scale))
    check(out, _ref_padding(xf, maski, scale), tol=1e-5)

    # 4) causal, small sk (single key-tile kernel) -----------------------------
    xc = jax.random.normal(k4, (2, 4, 64, 64), dtype=jnp.float32).astype(jnp.bfloat16)
    causal = FusedScaleMaskSoftmax(attn_mask_type="causal", scale=scale)
    out = jax.block_until_ready(causal(xc, None))
    check(out, _ref_causal(xc, scale))
    tri = jnp.triu(jnp.ones((64, 64), dtype=bool), k=1)
    assert jnp.all(jnp.where(tri[None, None], out.astype(jnp.float32), 0.0) == 0.0)

    # 5) causal, multi key-tile online path (block_q > block_k exercises the
    #    clamped-DMA skip, the deferred per-tile rescale and the zero tiles) ---
    xc2 = jax.random.normal(k2, (2, 2, 512, 512), dtype=jnp.float32).astype(jnp.bfloat16)
    out = jax.block_until_ready(
        scaled_upper_triang_masked_softmax(xc2, scale, block_q=256, block_k=128))
    check(out, _ref_causal(xc2, scale))
    tri = jnp.triu(jnp.ones((512, 512), dtype=bool), k=1)
    assert jnp.all(jnp.where(tri[None, None], out.astype(jnp.float32), 0.0) == 0.0)

    print("KERNEL_OK")
</pallas_src>

<mosaic_0001>
module attributes {stable_mosaic.version = 11 : i64} {
  func.func @_scaled_masked_softmax_kernel(%arg0: i32, %arg1: i32, %arg2: i32, %arg3: memref<1x4x16x256xbf16, #tpu.memory_space<vmem>>, %arg4: memref<1x1x16x256xi32, #tpu.memory_space<vmem>>, %arg5: memref<1x4x16x256xbf16, #tpu.memory_space<vmem>>) attributes {dimension_semantics = [#tpu.dimension_semantics<parallel>, #tpu.dimension_semantics<parallel>, #tpu.dimension_semantics<parallel>], iteration_bounds = array<i64: 2, 1, 1>, scalar_prefetch = 0 : i64, scratch_operands = 0 : i64, tpu.core_type = #tpu.core_type<tc>, window_params = [{transform_indices = @transform_0, window_bounds = array<i64: 1, 4, 16, 256>}, {transform_indices = @transform_1, window_bounds = array<i64: 1, 1, 16, 256>}, {transform_indices = @transform_2, window_bounds = array<i64: 1, 4, 16, 256>}]} {
    %c0 = arith.constant 0 : index
    %c0_0 = arith.constant 0 : index
    %c0_1 = arith.constant 0 : index
    %c0_2 = arith.constant 0 : index
    %0 = vector.load %arg3[%c0, %c0_0, %c0_1, %c0_2] : memref<1x4x16x256xbf16, #tpu.memory_space<vmem>>, vector<1x4x16x256xbf16>
    %1 = vector.shape_cast %0 : vector<1x4x16x256xbf16> to vector<4x16x256xbf16>
    %2 = arith.extf %1 : vector<4x16x256xbf16> to vector<4x16x256xf32>
    %cst = arith.constant 1.250000e-01 : f32
    %3 = vector.broadcast %cst : f32 to vector<4x16x256xf32>
    %4 = arith.mulf %2, %3 : vector<4x16x256xf32>
    %c0_3 = arith.constant 0 : index
    %c0_4 = arith.constant 0 : index
    %c0_5 = arith.constant 0 : index
    %c0_6 = arith.constant 0 : index
    %5 = vector.load %arg4[%c0_3, %c0_4, %c0_5, %c0_6] : memref<1x1x16x256xi32, #tpu.memory_space<vmem>>, vector<1x1x16x256xi32>
    %6 = vector.shape_cast %5 : vector<1x1x16x256xi32> to vector<1x16x256xi32>
    %cst_7 = arith.constant dense<0> : vector<1x16x256xi32>
    %7 = arith.cmpi ne, %6, %cst_7 : vector<1x16x256xi32>
    %cst_8 = arith.constant -1.000000e+04 : f32
    %8 = vector.shape_cast %7 : vector<1x16x256xi1> to vector<1x16x256xi1>
    %9 = vector.broadcast %8 : vector<1x16x256xi1> to vector<4x16x256xi1>
    %10 = vector.broadcast %cst_8 : f32 to vector<4x16x256xf32>
    %11 = arith.select %9, %10, %4 : vector<4x16x256xi1>, vector<4x16x256xf32>
    %cst_9 = arith.constant dense<0xFF800000> : vector<4x16xf32>
    %12 = vector.multi_reduction <maximumf>, %11, %cst_9 [2] : vector<4x16x256xf32> to vector<4x16xf32>
    %13 = vector.shape_cast %12 : vector<4x16xf32> to vector<4x16x1xf32>
    %14 = vector.broadcast %13 : vector<4x16x1xf32> to vector<4x16x256xf32>
    %15 = arith.subf %11, %14 : vector<4x16x256xf32>
    %16 = math.exp %15 : vector<4x16x256xf32>
    %cst_10 = arith.constant dense<0.000000e+00> : vector<4x16xf32>
    %17 = vector.multi_reduction <add>, %16, %cst_10 [2] : vector<4x16x256xf32> to vector<4x16xf32>
    %18 = vector.shape_cast %17 : vector<4x16xf32> to vector<4x16x1xf32>
    %19 = tpu.reciprocal %18 {approx = true} : vector<4x16x1xf32> -> vector<4x16x1xf32>
    %20 = vector.broadcast %19 : vector<4x16x1xf32> to vector<4x16x256xf32>
    %21 = arith.mulf %16, %20 : vector<4x16x256xf32>
    %22 = arith.truncf %21 : vector<4x16x256xf32> to vector<4x16x256xbf16>
    %c0_11 = arith.constant 0 : index
    %c0_12 = arith.constant 0 : index
    %c0_13 = arith.constant 0 : index
    %c0_14 = arith.constant 0 : index
    %23 = vector.load %arg5[%c0_11, %c0_12, %c0_13, %c0_14] : memref<1x4x16x256xbf16, #tpu.memory_space<vmem>>, vector<1x4x16x256xbf16>
    %24 = vector.shape_cast %23 : vector<1x4x16x256xbf16> to vector<4x16x256xbf16>
    %25 = vector.shape_cast %22 : vector<4x16x256xbf16> to vector<1x4x16x256xbf16>
    tpu.vector_store %arg5[%c0_11, %c0_12, %c0_13, %c0_14], %25 {strides = array<i32>} : memref<1x4x16x256xbf16, #tpu.memory_space<vmem>>, vector<1x4x16x256xbf16>,
    return
  }
  func.func @transform_0(%arg0: i32, %arg1: i32, %arg2: i32) -> (i32, i32, i32, i32) {
    %c0_i32 = arith.constant 0 : i32
    %c0_i32_0 = arith.constant 0 : i32
    return %arg0, %arg2, %arg1, %c0_i32 : i32, i32, i32, i32
  }
  func.func @transform_1(%arg0: i32, %arg1: i32, %arg2: i32) -> (i32, i32, i32, i32) {
    %c0_i32 = arith.constant 0 : i32
    %c0_i32_0 = arith.constant 0 : i32
    %c0_i32_1 = arith.constant 0 : i32
    return %arg0, %c0_i32, %arg1, %c0_i32_0 : i32, i32, i32, i32
  }
  func.func @transform_2(%arg0: i32, %arg1: i32, %arg2: i32) -> (i32, i32, i32, i32) {
    %c0_i32 = arith.constant 0 : i32
    %c0_i32_0 = arith.constant 0 : i32
    return %arg0, %arg2, %arg1, %c0_i32 : i32, i32, i32, i32
  }
}

</mosaic_0001>

<bundles_post_ra>
// kernel: tpu_custom_call.1
= control target key start
LH: loop header
LB: loop body
LE: loop exit
PB: predicated region body
PF: predicated region fallthrough
CT: control target
= control target key end

     0   :  { %7 = vsyncpa [#allocation3], 0  ;;  %s1123_s0 = inlined_call_operand.hbm [shape: bf16[2,4,16,256], index: 0, kind: input, shape index: {}]   ;;  %s1124_s1 = inlined_call_operand.vmem [shape: s32[2,1,16,256], index: 1, kind: input, shape index: {}]   ;;  %s1125_s2 = inlined_call_operand.hbm [shape: bf16[2,4,16,256], index: 2, kind: output, shape index: {}]  }
   0x1   :  { %9 = vsyncpa [#allocation3 + $0x1], 0 }
   0x2   :  { %10 = vsyncpa [#allocation4], 0 }
   0x3   :  { %12 = vsyncpa [#allocation4 + $0x1], 0  ;;  %s902_s9 = smov 0   ;;  %s904_s10 = smov 0  }
   0x4   :  { %s906_s11 = smov 0   ;;  %s908_s12 = smov 0  }
   0x5   :  { %s910_s13 = smov 0   ;;  %s912_s14 = smov 0  }
   0x6 LB: > { %s621_s15 = sadd.s32 4294967295, %s879_s14   ;;  %s622_s16 = sadd.s32 4294967294, %s879_s14   ;;  %s879_s14 = sphi %s912_s14, %s18_s14   ;;  %s875_s13 = sphi %s910_s13, %s1136_s13   ;;  %s871_s12 = sphi %s908_s12, %s1135_s12   ;;  %s867_s11 = sphi %s906_s11, %s1134_s11   ;;  %s863_s10 = sphi %s904_s10, %s1133_s10   ;;  %s859_s9 = sphi %s902_s9, %s1132_s9  }
   0x7   : > { %s37_s17 = sadd.s32 1, %s875_s13  ;;  %s48_s18 = sadd.s32 1, %s867_s11 }
   0x8   : > { %p39_p0 = scmp.ge.s32.totalorder %s37_s17, 2  ;;  %p55_p1 = scmp.ne.s32.totalorder %s867_s11, %s863_s10 }
   0x9   : > { %p56_p2 = scmp.eq.s32.totalorder %s879_s14, 0  ;;  %p61_p3 = scmp.ne.s32.totalorder %s863_s10, %s859_s9 }
   0xa   : > { %s1138_s17 = smov (%p39_p0, %s37_s17), 0  ;;  %p62_p5 = scmp.eq.s32.totalorder %s621_s15, 0 }
   0xb   : > { %p943_p4 = por %p56_p2, %p55_p1  ;;  %s41_s20 = ssub.s32 %s875_s13, %s1138_s17 }
   0xc   : > { %p117_p6 = scmp.eq.s32.totalorder %s621_s15, 1  ;;  %p46_p7 = scmp.eq.s32.totalorder %s41_s20, 0 }
   0xd   : > { %p949_p8 = por %p62_p5, %p61_p3  ;;  %p123_p10 = scmp.eq.s32.totalorder %s622_s16, 1 }
   0xe   : > { %p953_p9 = por %p117_p6, %p55_p1  ;;  %p669_p13 = scmp.lt.s32.totalorder %s879_s14, 2 }
   0xf   : > { %s958_s23 = scalar_select %p46_p7, %s867_s11, %s48_s18  }
  0x10   : > { %p960_p11 = por %p123_p10, %p61_p3  ;;  %s143_s25 = sand.u32 1, %s867_s11  }
  0x11   : > { %s625_s26 = sshll.u32 %s143_s25, 6  ;;  %s646_s27 = sshll.u32 %s875_s13, 10 }
  0x12   : > { %s159_s30 = scalar_lea.hbm %s1123_s0, %s646_s27  ;;  %s147_s3 = scalar_lea.vmem [#allocation2], %s625_s26 }
  0x13   : > { %s160_s4 = sshll.u32 %s147_s3, 4  ;;  %p973_p0 = pnand %p669_p13, %p943_p4  ;;  %s161_s4 = int_to_ptr.vmem [resolvable:$true] %s160_s4 }
  0x14   : > { %p628_p1 = scmp.ge.s32.totalorder %s879_s14, 1  ;;  %s144_s6 = scalar_lea.sflag [#allocation3], %s143_s25 }
  0x15   : > { %p773_p2 = pneg %p973_p0  ;;  %s784_s7 = scalar_lea.vmem %s161_s4, 1024 }
  0x16   : > { %p785_p3 = scmp.ne.s32.totalorder %s161_s4, %s784_s7  ;;  %s881_s8 = smov [#allocation2]  }
  0x17   : > { %s789_s15 = sshll.u32 %s881_s8, 4  ;;  %s790_s15 = int_to_ptr.vmem [resolvable:$false] %s789_s15 }
  0x18   : > { %p787_p5 = pnand %p785_p3, %p773_p2  ;;  %s791_s16 = scalar_lea.vmem %s790_s15, 2048 }
  0x19   : > { %p792_p7 = scmp.lt.s32.totalorder %s161_s4, %s790_s15  ;;  %p793_p10 = scmp.lt.s32.totalorder %s791_s16, %s784_s7 }
  0x1a   : > { %p788_p6 = pneg %p787_p5 }
  0x1b   : > { %p794_p12 = por %p793_p10, %p792_p7 }
  0x1d   : > { %p795_p4 = pnand %p794_p12, %p788_p6 }
  0x1f   : > { %798 = shalt.err (!%p795_p4)
}
  0x20   : > { %s882_s18 = smov 128   ;;  %s883_s19 = smov 8  }
  0x21   : > { %664 = dma.hbm_to_vmem [thread:$0]  (!%p973_p0), %s159_s30, 1024, %s161_s4, %s144_s6, %s882_s18, %s882_s18, %s883_s19  }
  0x22   : > { %p182_p13 = scmp.lt.s32.totalorder %s879_s14, 3 }
  0x24   : > { %p183_p2 = pnand %p628_p1, %p182_p13 }
  0x25   : > { %s986_s20 = sand.u32 (!%p183_p2), 1, %s863_s10  }
  0x26   : > { %186 = sbr.rel (%p183_p2) target bundleno = 400 (0x190), region = 28  ;;  %s629_s25 = sshll.u32 (!%p183_p2), %s986_s20, 6 }
  0x27   : > { %s189_s26 = scalar_lea.sflag (!%p183_p2), [#allocation3], %s986_s20  ;;  %s992_s27 = scalar_lea.vmem (!%p183_p2), [#allocation2], %s629_s25 }
  0x2b   : > { %850 = dma.done.wait (%p949_p8), %s189_s26, 1024  }
  0x2c   : > { %852 = vsyncadd (%p949_p8), %s189_s26, 4294966272  ;;  %p226_p12 = scmp.lt.s32.totalorder %s871_s12, 1  ;;  %v238_v0 = vld [vmem:[%s992_s27] sm:$0xff]  ;;  %v240_v5 = vld [vmem:[%s992_s27 + $0x10] sm:$0xff]  ;;  %s1058_s21 = scalar_lea.vmem [#allocation5], %s629_s25 }
  0x2d   : > { %v246_v3 = vunpack.c.l.bf16 %v238_v0  ;;  %v247_v4 = vunpack.c.h.bf16 %v238_v0  ;;  %v239_v6 = vld [vmem:[%s992_s27 + $0x8] sm:$0xff]  ;;  %v250_v8 = vunpack.c.l.bf16 %v240_v5  ;;  %v251_v9 = vunpack.c.h.bf16 %v240_v5  ;;  %v241_v13 = vld [vmem:[%s992_s27 + $0x18] sm:$0xff]  ;;  %v242_v24 = vld [vmem:[%s992_s27 + $0x20] sm:$0xff]  ;;  %s656_s5 = sshll.u32 %s871_s12, 10  ;;  %s506_s6 = sshll.u32 %s1058_s21, 4  ;;  %s1074_s6 = int_to_ptr.vmem [resolvable:$true] %s506_s6 }
  0x2e   : > { %s227_s28 = scalar_select %p226_p12, %s871_s12, 1  ;;  %v248_v10 = vunpack.c.l.bf16 %v239_v6  ;;  %v249_v11 = vunpack.c.h.bf16 %v239_v6  ;;  %v252_v22 = vunpack.c.l.bf16 %v241_v13  ;;  %v253_v23 = vunpack.c.h.bf16 %v241_v13  ;;  %v243_v25 = vld [vmem:[%s992_s27 + $0x28] sm:$0xff]  ;;  %v244_v30 = vld [vmem:[%s992_s27 + $0x30] sm:$0xff]  ;;  %v245_v39 = vld [vmem:[%s992_s27 + $0x38] sm:$0xff] }
  0x2f   : > { %v262_v14 = vmul.f32 0.125, %v246_v3  ;;  %v263_v15 = vmul.f32 0.125, %v247_v4  ;;  %v266_v16 = vmul.f32 0.125, %v250_v8  ;;  %v267_v17 = vmul.f32 0.125, %v251_v9  ;;  %s1072_s15 = scalar_lea.hbm %s1125_s2, %s656_s5  ;;  %s487_s12 = scalar_lea.sflag [#allocation4], %s986_s20 }
  0x30   : > { %s647_s29 = sshll.u32 %s227_s28, 5  ;;  %v264_v18 = vmul.f32 0.125, %v248_v10  ;;  %v265_v19 = vmul.f32 0.125, %v249_v11  ;;  %v268_v33 = vmul.f32 0.125, %v252_v22  ;;  %v269_v34 = vmul.f32 0.125, %v253_v23  ;;  %s799_s16 = scalar_lea.vmem %s1074_s6, 1024 }
  0x31   : > { %s234_s4 = scalar_lea.vmem %s1124_s1, %s647_s29  ;;  %v254_v36 = vunpack.c.l.bf16 %v242_v24  ;;  %v255_v37 = vunpack.c.h.bf16 %v242_v24  ;;  %v256_v38 = vunpack.c.l.bf16 %v243_v25  ;;  %v257_v42 = vunpack.c.h.bf16 %v243_v25  ;;  %p800_p8 = scmp.ne.s32.totalorder %s1074_s6, %s799_s16 }
  0x32   : > { %v1004_v1 = vld [vmem:[%s234_s4] sm:$0xff]  ;;  %v1006_v2 = vld [vmem:[%s234_s4 + $0x8] sm:$0xff]  ;;  %v1012_v7 = vld [vmem:[%s234_s4 + $0x10] sm:$0xff]  ;;  %v258_v43 = vunpack.c.l.bf16 %v244_v30  ;;  %v259_v49 = vunpack.c.h.bf16 %v244_v30  ;;  %v260_v51 = vunpack.c.l.bf16 %v245_v39  ;;  %v261_v55 = vunpack.c.h.bf16 %v245_v39  ;;  %s884_s18 = smov [#allocation5]  }
  0x33   : > { %vm282_vm0 = vcmp.ne.s32.totalorder %v1004_v1, 0  ;;  %vm283_vm1 = vcmp.ne.s32.totalorder %v1006_v2, 0  ;;  %v281_v12 = vld [vmem:[%s234_s4 + $0x18] sm:$0xff]  ;;  %vm284_vm2 = vcmp.ne.s32.totalorder %v1012_v7, 0  ;;  %v270_v45 = vmul.f32 0.125, %v254_v36  ;;  %p801_p0 = pnand %p800_p8, %p953_p9  ;;  %s803_s19 = sshll.u32 %s884_s18, 4  ;;  %s804_s19 = int_to_ptr.vmem [resolvable:$false] %s803_s19 }
  0x34   : > { %vm285_vm3 = vcmp.ne.s32.totalorder %v281_v12, 0  ;;  %v294_v20 = vsel %vm282_vm0, -10000.0, %v262_v14  ;;  %v295_v21 = vsel %vm283_vm1, -10000.0, %v263_v15  ;;  %v298_v27 = vsel %vm282_vm0, -10000.0, %v266_v16  ;;  %s805_s25 = scalar_lea.vmem %s804_s19, 2048  ;;  %p806_p3 = scmp.lt.s32.totalorder %s1074_s6, %s804_s19 }
  0x35   : > { %v310_v26 = vmax.f32 %v294_v20, %v295_v21  ;;  %v299_v28 = vsel %vm283_vm1, -10000.0, %v267_v17  ;;  %v1028_v29 = vsel %vm284_vm2, -10000.0, %v264_v18  ;;  %v1032_v32 = vsel %vm285_vm3, -10000.0, %v265_v19  ;;  %p802_p1 = pneg %p801_p0  ;;  %p807_p5 = scmp.lt.s32.totalorder %s805_s25, %s799_s16 }
  0x36   : > { %v316_v31 = vmax.f32 %v298_v27, %v299_v28  ;;  %v313_v35 = vmax.f32 %v1028_v29, %v1032_v32  ;;  %v300_v40 = vsel %vm284_vm2, -10000.0, %v268_v33  ;;  %v301_v41 = vsel %vm285_vm3, -10000.0, %v269_v34 }
  0x37   : > { %311 = vmax.xlane.f32.xlu0 %v310_v26  ;;  %v319_v44 = vmax.f32 %v300_v40, %v301_v41  ;;  %v271_v46 = vmul.f32 0.125, %v255_v37  ;;  %v272_v47 = vmul.f32 0.125, %v256_v38  ;;  %v273_v48 = vmul.f32 0.125, %v257_v42  ;;  %p808_p6 = por %p807_p5, %p806_p3 }
  0x38   : > { %317 = vmax.xlane.f32.xlu1 %v316_v31  ;;  %v274_v50 = vmul.f32 0.125, %v258_v43  ;;  %v302_v52 = vsel %vm282_vm0, -10000.0, %v270_v45  ;;  %v275_v58 = vmul.f32 0.125, %v259_v49  ;;  %v276_v61 = vmul.f32 0.125, %v260_v51 }
  0x39   : > { %v303_v53 = vsel %vm283_vm1, -10000.0, %v271_v46  ;;  %v304_v54 = vsel %vm284_vm2, -10000.0, %v272_v47  ;;  %v305_v57 = vsel %vm285_vm3, -10000.0, %v273_v48  ;;  %v277_v62 = vmul.f32 0.125, %v261_v55  ;;  %p809_p7 = pnand %p808_p6, %p802_p1 }
  0x3a   : > { %v322_v56 = vmax.f32 %v302_v52, %v303_v53  ;;  %v306_v59 = vsel %vm282_vm0, -10000.0, %v274_v50  ;;  %v325_v60 = vmax.f32 %v304_v54, %v305_v57  ;;  %v307_v63 = vsel %vm283_vm1, -10000.0, %v275_v58 }
  0x3b   : > { %314 = vmax.xlane.f32.xlu0 %v313_v35  ;;  %v328_v0 = vmax.f32 %v306_v59, %v307_v63  ;;  %v308_v3 = vsel %vm284_vm2, -10000.0, %v276_v61  ;;  %v309_v4 = vsel %vm285_vm3, -10000.0, %v277_v62 }
  0x3c   : > { %320 = vmax.xlane.f32.xlu1 %v319_v44  ;;  %v331_v5 = vmax.f32 %v308_v3, %v309_v4 }
  0x3f   : > { %323 = vmax.xlane.f32.xlu0 %v322_v56 }
  0x40   : > { %326 = vmax.xlane.f32.xlu1 %v325_v60 }
  0x43   : > { %329 = vmax.xlane.f32.xlu0 %v328_v0 }
  0x44   : > { %332 = vmax.xlane.f32.xlu1 %v331_v5 }
  0xc0   : > { %v312_v6 = vpop.xlane.xlu0 %311 }
  0xc1   : > { %v334_v1 = vsub.f32 %v294_v20, %v312_v6  ;;  %v335_v8 = vsub.f32 %v295_v21, %v312_v6  ;;  %v318_v9 = vpop.xlane.xlu1 %317 }
  0xc2   : > { %v338_v10 = vsub.f32 %v298_v27, %v318_v9  ;;  %v339_v11 = vsub.f32 %v299_v28, %v318_v9 }
  0xc3   : > { %v350_v13 = vmul.f32 1.442695, %v334_v1  ;;  %v352_v2 = vmul.f32 1.442695, %v335_v8 }
  0xc4   : > { %v358_v14 = vmul.f32 1.442695, %v338_v10  ;;  %v360_v15 = vmul.f32 1.442695, %v339_v11  ;;  %v315_v16 = vpop.xlane.xlu0 %314 }
  0xc5   : > { %723 = vpow2.f32 %v350_v13  ;;  %v336_v7 = vsub.f32 %v1028_v29, %v315_v16  ;;  %v337_v12 = vsub.f32 %v1032_v32, %v315_v16  ;;  %v321_v17 = vpop.xlane.xlu1 %320 }
  0xc6   : > { %725 = vpow2.f32 %v352_v2  ;;  %v340_v18 = vsub.f32 %v300_v40, %v321_v17  ;;  %v341_v19 = vsub.f32 %v301_v41, %v321_v17 }
  0xc7   : > { %727 = vpow2.f32 %v358_v14  ;;  %v354_v20 = vmul.f32 1.442695, %v336_v7  ;;  %v356_v21 = vmul.f32 1.442695, %v337_v12 }
  0xc8   : > { %729 = vpow2.f32 %v360_v15  ;;  %v362_v22 = vmul.f32 1.442695, %v340_v18  ;;  %v364_v23 = vmul.f32 1.442695, %v341_v19  ;;  %v324_v24 = vpop.xlane.xlu0 %323 }
  0xc9   : > { %731 = vpow2.f32 %v354_v20  ;;  %v342_v25 = vsub.f32 %v302_v52, %v324_v24  ;;  %v343_v26 = vsub.f32 %v303_v53, %v324_v24  ;;  %v327_v27 = vpop.xlane.xlu1 %326 }
  0xca   : > { %733 = vpow2.f32 %v356_v21  ;;  %v344_v28 = vsub.f32 %v304_v54, %v327_v27  ;;  %v345_v29 = vsub.f32 %v305_v57, %v327_v27 }
  0xcb   : > { %735 = vpow2.f32 %v362_v22  ;;  %v366_v30 = vmul.f32 1.442695, %v342_v25  ;;  %v368_v31 = vmul.f32 1.442695, %v343_v26 }
  0xcc   : > { %737 = vpow2.f32 %v364_v23  ;;  %v370_v32 = vmul.f32 1.442695, %v344_v28  ;;  %v372_v33 = vmul.f32 1.442695, %v345_v29  ;;  %v330_v34 = vpop.xlane.xlu0 %329 }
  0xcd   : > { %739 = vpow2.f32 %v366_v30  ;;  %v346_v35 = vsub.f32 %v306_v59, %v330_v34  ;;  %v347_v36 = vsub.f32 %v307_v63, %v330_v34  ;;  %v333_v37 = vpop.xlane.xlu1 %332 }
  0xce   : > { %741 = vpow2.f32 %v368_v31  ;;  %v348_v38 = vsub.f32 %v308_v3, %v333_v37  ;;  %v349_v39 = vsub.f32 %v309_v4, %v333_v37 }
  0xcf   : > { %743 = vpow2.f32 %v370_v32  ;;  %v374_v40 = vmul.f32 1.442695, %v346_v35  ;;  %v376_v41 = vmul.f32 1.442695, %v347_v36 }
  0xd0   : > { %745 = vpow2.f32 %v372_v33  ;;  %v378_v42 = vmul.f32 1.442695, %v348_v38  ;;  %v380_v43 = vmul.f32 1.442695, %v349_v39 }
  0xd1   : > { %747 = vpow2.f32 %v374_v40 }
  0xd2   : > { %v724_v44 = vpop.eup %723  ;;  %749 = vpow2.f32 %v376_v41 }
  0xd3   : > { %v726_v45 = vpop.eup %725  ;;  %751 = vpow2.f32 %v378_v42 }
  0xd4   : > { %v728_v46 = vpop.eup %727  ;;  %753 = vpow2.f32 %v380_v43  ;;  %v382_v47 = vadd.f32 %v726_v45, %v724_v44 }
  0xd5   : > { %v730_v48 = vpop.eup %729 }
  0xd6   : > { %v732_v49 = vpop.eup %731  ;;  %383 = vadd.xlane.f32.xlu0 %v382_v47  ;;  %v388_v50 = vadd.f32 %v730_v48, %v728_v46 }
  0xd7   : > { %v734_v51 = vpop.eup %733 }
  0xd8   : > { %v736_v52 = vpop.eup %735  ;;  %v385_v53 = vadd.f32 %v734_v51, %v732_v49 }
  0xd9   : > { %v738_v54 = vpop.eup %737 }
  0xda   : > { %v740_v55 = vpop.eup %739  ;;  %389 = vadd.xlane.f32.xlu0 %v388_v50  ;;  %386 = vadd.xlane.f32.xlu1 %v385_v53  ;;  %v391_v56 = vadd.f32 %v738_v54, %v736_v52 }
  0xdb   : > { %v742_v57 = vpop.eup %741 }
  0xdc   : > { %v744_v58 = vpop.eup %743  ;;  %v394_v59 = vadd.f32 %v742_v57, %v740_v55 }
  0xdd   : > { %v746_v60 = vpop.eup %745 }
  0xde   : > { %v748_v61 = vpop.eup %747  ;;  %392 = vadd.xlane.f32.xlu1 %v391_v56  ;;  %395 = vadd.xlane.f32.xlu0 %v394_v59  ;;  %v397_v62 = vadd.f32 %v746_v60, %v744_v58 }
  0xdf   : > { %v750_v63 = vpop.eup %749 }
  0xe0   : > { %v752_v0 = vpop.eup %751  ;;  %v400_v3 = vadd.f32 %v750_v63, %v748_v61 }
  0xe1   : > { %v754_v4 = vpop.eup %753 }
  0xe2   : > { %398 = vadd.xlane.f32.xlu1 %v397_v62  ;;  %401 = vadd.xlane.f32.xlu0 %v400_v3  ;;  %v403_v5 = vadd.f32 %v754_v4, %v752_v0 }
  0xe6   : > { %404 = vadd.xlane.f32.xlu1 %v403_v5 }
 0x15f   : > { %v384_v6 = vpop.xlane.xlu0 %383 }
 0x160   : > { %755 = vrcp.f32 %v384_v6 }
 0x163   : > { %v387_v1 = vpop.xlane.xlu1 %386  ;;  %v390_v8 = vpop.xlane.xlu0 %389 }
 0x164   : > { %757 = vrcp.f32 %v387_v1 }
 0x165   : > { %759 = vrcp.f32 %v390_v8 }
 0x167   : > { %v393_v9 = vpop.xlane.xlu1 %392  ;;  %v396_v10 = vpop.xlane.xlu0 %395 }
 0x168   : > { %761 = vrcp.f32 %v393_v9 }
 0x169   : > { %763 = vrcp.f32 %v396_v10 }
 0x16b   : > { %v399_v11 = vpop.xlane.xlu1 %398  ;;  %v402_v13 = vpop.xlane.xlu0 %401 }
 0x16c   : > { %765 = vrcp.f32 %v399_v11 }
 0x16d   : > { %v756_v2 = vpop.eup %755  ;;  %767 = vrcp.f32 %v402_v13 }
 0x16e   : > { %v414_v14 = vmul.f32 %v756_v2, %v724_v44  ;;  %v415_v15 = vmul.f32 %v756_v2, %v726_v45 }
 0x16f   : > { %v405_v16 = vpop.xlane.xlu1 %404 }
 0x170   : > { %v648_v7 = vpack.c.bf16 %v415_v15, %v414_v14  ;;  %769 = vrcp.f32 %v405_v16 }
 0x171   : > { %v758_v12 = vpop.eup %757 }
 0x172   : > { %v760_v17 = vpop.eup %759  ;;  %478 = vst [vmem:[%s1058_s21] sm:$0xff] %v648_v7  ;;  %v416_v18 = vmul.f32 %v758_v12, %v732_v49  ;;  %v417_v19 = vmul.f32 %v758_v12, %v734_v51 }
 0x173   : > { %v418_v20 = vmul.f32 %v760_v17, %v728_v46  ;;  %v419_v21 = vmul.f32 %v760_v17, %v730_v48 }
 0x174   : > { %v649_v22 = vpack.c.bf16 %v417_v19, %v416_v18 }
 0x175   : > { %v762_v23 = vpop.eup %761  ;;  %v650_v24 = vpack.c.bf16 %v419_v21, %v418_v20 }
 0x176   : > { %v764_v25 = vpop.eup %763  ;;  %479 = vst [vmem:[%s1058_s21 + $0x8] sm:$0xff] %v649_v22  ;;  %v420_v26 = vmul.f32 %v762_v23, %v736_v52  ;;  %v421_v27 = vmul.f32 %v762_v23, %v738_v54 }
 0x177   : > { %480 = vst [vmem:[%s1058_s21 + $0x10] sm:$0xff] %v650_v24  ;;  %v422_v28 = vmul.f32 %v764_v25, %v740_v55  ;;  %v423_v29 = vmul.f32 %v764_v25, %v742_v57 }
 0x178   : > { %v651_v30 = vpack.c.bf16 %v421_v27, %v420_v26 }
 0x179   : > { %v766_v31 = vpop.eup %765  ;;  %v652_v32 = vpack.c.bf16 %v423_v29, %v422_v28 }
 0x17a   : > { %v768_v33 = vpop.eup %767  ;;  %481 = vst [vmem:[%s1058_s21 + $0x18] sm:$0xff] %v651_v30  ;;  %v424_v34 = vmul.f32 %v766_v31, %v744_v58  ;;  %v425_v35 = vmul.f32 %v766_v31, %v746_v60 }
 0x17b   : > { %482 = vst [vmem:[%s1058_s21 + $0x20] sm:$0xff] %v652_v32  ;;  %v426_v36 = vmul.f32 %v768_v33, %v748_v61  ;;  %v427_v37 = vmul.f32 %v768_v33, %v750_v63 }
 0x17c   : > { %v653_v38 = vpack.c.bf16 %v425_v35, %v424_v34 }
 0x17d   : > { %v770_v39 = vpop.eup %769  ;;  %v654_v40 = vpack.c.bf16 %v427_v37, %v426_v36 }
 0x17e   : > { %483 = vst [vmem:[%s1058_s21 + $0x28] sm:$0xff] %v653_v38  ;;  %v428_v41 = vmul.f32 %v770_v39, %v752_v0  ;;  %v429_v42 = vmul.f32 %v770_v39, %v754_v4 }
 0x17f   : > { %484 = vst [vmem:[%s1058_s21 + $0x30] sm:$0xff] %v654_v40 }
 0x180   : > { %v655_v43 = vpack.c.bf16 %v429_v42, %v428_v41 }
 0x182   : > { %485 = vst [vmem:[%s1058_s21 + $0x38] sm:$0xff] %v655_v43 }
 0x183   : > { %812 = shalt.err (!%p809_p7)
}
 0x184   : > { %s813_s26 = scalar_lea.hbm %s1072_s15, 1024  ;;  %s817_s29 = scalar_lea.hbm %s1125_s2, 2048 }
 0x185   : > { %p814_p10 = scmp.ne.s32.totalorder %s1072_s15, %s813_s26  ;;  %p818_p2 = scmp.lt.s32.totalorder %s1072_s15, %s1125_s2 }
 0x186   : > { %p819_p12 = scmp.lt.s32.totalorder %s817_s29, %s813_s26 }
 0x187   : > { %p815_p4 = pnand %p814_p10, %p953_p9 }
 0x188   : > { %p820_p8 = por %p819_p12, %p818_p2 }
 0x189   : > { %p816_p13 = pneg %p815_p4 }
 0x18b   : > { %p821_p0 = pnand %p820_p8, %p816_p13 }
 0x18d   : > { %824 = shalt.err (!%p821_p0)
}
 0x18e   : > { %s885_s4 = smov 128   ;;  %s886_s21 = smov 8  }
 0x18f   : > { %659 = dma.vmem_to_hbm [thread:$0]  (%p953_p9), %s1074_s6, 1024, %s1072_s15, %s487_s12, %s885_s4, %s885_s4, %s886_s21  }
 0x190 PF: > { %s521_s5 = sand.u32 1, %s859_s9   ;;  %p1131_p1 = scmp.ge.s32.totalorder %s879_s14, 2 }
 0x191   : > { %s522_s7 = scalar_lea.sflag [#allocation4], %s521_s5 }
 0x192   : > { %p666_p3 = pnand %p1131_p1, %p960_p11 }
 0x194   : > { %p667_p5 = pneg %p666_p3 }
 0x196   : > { %854 = dma.done.wait (%p667_p5), %s522_s7, 1024  }
 0x197   : > { %856 = vsyncadd (%p667_p5), %s522_s7, 4294966272  ;;  %s18_s14 = sadd.s32 1, %s879_s14   ;;  %s1132_s9 = smov %s863_s10 }
 0x198   : > { %p15_p6 = scmp.ge.s32.totalorder %s18_s14, 4   ;;  %s1133_s10 = smov %s867_s11 }
 0x199   : > { %s1134_s11 = smov %s958_s23  ;;  %s1135_s12 = smov %s875_s13 }
 0x19a   : > { %s1136_s13 = smov %s1138_s17  ;;  %17 = sbr.rel (!%p15_p6) target bundleno = 6 (0x6), region = 76 }
 0x19f   :  { %527 = vsyncpa [#allocation3], 1 }
 0x1a0   :  { %529 = vsyncpa [#allocation3 + $0x1], 1 }
 0x1a1   :  { %530 = vsyncpa [#allocation4], 1 }
 0x1a2   :  { %532 = vsyncpa [#allocation4 + $0x1], 1 }

</bundles_post_ra>
